<compile_context>
chip_gen: v7x
topology: tpu7x:2x2x1
jax: 0.10.0
libtpu: 0.0.40
codegen_flags: <defaults>
</compile_context>

<pallas_src>
import functools

import jax
import jax.numpy as jnp
import numpy as np
from jax.experimental import pallas as pl
from jax.experimental.pallas import tpu as pltpu

EPS = 1e-8
_LANES = 128


def dce_kernel(x_ref, labels_ref, packed_ref, *, n_valid):
    """Whole DCE forward in one invocation on a lane-major layout.

    Inputs:
      x_ref      : (C, N_pad) logits, native dtype (classes on sublanes,
                   batch on lanes; padding columns are zeros).
      labels_ref : (1, N_pad) int32 labels (padding columns hold C ->
                   all-zero one-hot).
    Output:
      packed_ref : (8, N_pad) f32 lane-dense slab:
                     row 0, lanes [0, N)  : confident mask (1.0 / 0.0)
                     row 1, lanes [0, C)  : per-class mean probability `avg`
                     rows [2, 8)          : never written, never read.
    """
    x = x_ref[...].astype(jnp.float32)                 # single f32 cast
    labels = labels_ref[...]                           # (1, Np) int32
    c, n_pad = x.shape

    cls_ids = jax.lax.broadcasted_iota(jnp.int32, (c, n_pad), 0)
    lane_ids = jax.lax.broadcasted_iota(jnp.int32, (c, n_pad), 1)

    # y_true = one_hot(target_label, C), transposed to (C, Np).
    y_true = (cls_ids == labels).astype(jnp.float32)

    # y_pred = clamp(softmax(prediction over classes), eps, 1 - eps)
    m = jnp.max(x, axis=0, keepdims=True)              # (1, Np) sublane reduce
    e = jnp.exp(x - m)
    s = jnp.sum(e, axis=0, keepdims=True)              # (1, Np)
    r = pl.reciprocal(s, approx=True)                  # EUP slot
    r = r * (2.0 - s * r)                              # one Newton step (near-exact)
    y_pred = jnp.clip(e * r, EPS, 1.0 - EPS)           # (C, Np)

    # Exclude lane padding from the batch mean.
    valid = (jax.lax.broadcasted_iota(jnp.int32, (1, n_pad), 1)
             < n_valid).astype(jnp.float32)            # (1, Np)

    pred_tmp = jnp.sum(y_true * y_pred, axis=0, keepdims=True)              # (1, Np)
    avg = jnp.sum(y_pred * valid, axis=1, keepdims=True) * (1.0 / n_valid)  # (C, 1)
    avg_sel = jnp.sum(y_true * avg, axis=0, keepdims=True)                  # (1, Np)

    # pred = where(pred_tmp >= avg_ref, pred_tmp, 0); since pred_tmp >= eps > 0,
    # (pred != 0)  <=>  (pred_tmp >= avg_ref).
    conf = (pred_tmp >= avg_sel).astype(jnp.float32)                        # (1, Np)

    # Lay `avg` out lane-wise: lane j holds avg[j] for j < C, 0 elsewhere
    # (tiny mask+sublane-reduce "mini transpose"; keeps the store lane-dense).
    diag = (cls_ids == lane_ids).astype(jnp.float32)
    avg_row = jnp.sum(diag * avg, axis=0, keepdims=True)                    # (1, Np)

    # Two lane-dense row stores; no slab zero-init, no masked lane store.
    packed_ref[0:1, :] = conf
    packed_ref[1:2, :] = avg_row


def dce_forward(prediction, target_label, num_class=7):
    """Jittable DCE forward.

    Returns (weighted_loss, confident_idx, noisy_idx, avg, n_confident).
    confident_idx / noisy_idx are fixed-shape (N,) int32 arrays holding the
    valid indices (ascending) followed by the sentinel value N; n_confident
    gives the number of valid entries in confident_idx (N - n_confident for
    noisy_idx).  This replaces torch.where(...)[0]'s variable-length outputs
    with static-shape, device-only equivalents (no host sync).
    """
    n = prediction.shape[0]
    c = num_class
    n_pad = ((n + _LANES - 1) // _LANES) * _LANES

    # Lane-major layout: N on lanes, C on sublanes (pure layout plumbing).
    x_t = jnp.pad(prediction.T, ((0, 0), (0, n_pad - n)))
    labels_row = jnp.pad(target_label.astype(jnp.int32).reshape(1, n),
                         ((0, 0), (0, n_pad - n)), constant_values=c)

    packed = pl.pallas_call(
        functools.partial(dce_kernel, n_valid=n),
        out_shape=jax.ShapeDtypeStruct((8, n_pad), jnp.float32),
        in_specs=[
            pl.BlockSpec(memory_space=pltpu.MemorySpace.VMEM),   # logits, native dtype
            pl.BlockSpec(memory_space=pltpu.MemorySpace.VMEM),   # labels (1, N_pad)
        ],
        out_specs=pl.BlockSpec(memory_space=pltpu.MemorySpace.VMEM),
    )(x_t, labels_row)

    conf_mask = packed[0, :n] > 0.5                    # (N,) bool
    avg = packed[1, :c]                                # (C,)

    idx = jnp.arange(n, dtype=jnp.int32)
    n_conf = jnp.sum(conf_mask.astype(jnp.int32))
    # Single argsort: confident indices (ascending) first, noisy (ascending) after.
    perm = jnp.argsort(jnp.where(conf_mask, idx, idx + n)).astype(jnp.int32)
    confident_idx = jnp.where(idx < n_conf, perm, n).astype(jnp.int32)
    noisy_src = jnp.take(perm, (idx + n_conf) % n, axis=0)
    noisy_idx = jnp.where(idx < n - n_conf, noisy_src, n).astype(jnp.int32)

    # TODO(synk): the reference feeds a 1-column tensor to F.cross_entropy (and
    # references undefined `confident_idx`/`noisy_idx`); log-softmax over a
    # single class is identically 0, so the loss is 0.  Reproduced literally
    # as a compile-time constant (no SMEM output / writeback needed).
    weighted_loss = jnp.float32(0.0)

    return weighted_loss, confident_idx, noisy_idx, avg, n_conf


if __name__ == "__main__":
    key = jax.random.PRNGKey(0)
    k1, k2 = jax.random.split(key)
    N, C = 8, 7                                   # batch=8, num_class=7 (module default)
    prediction = jax.random.normal(k1, (N, C), dtype=jnp.float32)
    target_label = jax.random.randint(k2, (N,), 0, C, dtype=jnp.int32)

    fwd = jax.jit(dce_forward, static_argnames=("num_class",))
    loss, conf_idx, noise_idx, avg, n_conf = fwd(prediction, target_label, num_class=C)
    jax.block_until_ready((loss, conf_idx, noise_idx, avg, n_conf))

    # --- pure-JAX reference check of the in-kernel math (exact division) ---
    yp = jnp.clip(jax.nn.softmax(prediction, axis=1), EPS, 1.0 - EPS)
    yt = jax.nn.one_hot(target_label, C, dtype=jnp.float32)
    pred_tmp_ref = jnp.sum(yt * yp, axis=1)
    avg_full_ref = jnp.mean(yp, axis=0)
    avg_sel_ref = yt @ avg_full_ref
    margin = np.asarray(pred_tmp_ref - avg_sel_ref)
    ref_mask = margin >= 0.0

    nc = int(n_conf)
    conf_np = np.asarray(conf_idx)
    noise_np = np.asarray(noise_idx)

    # Padded-index structure: valid prefix, sentinel N afterwards; disjoint partition.
    assert np.all(conf_np[nc:] == N)
    assert np.all(noise_np[N - nc:] == N)
    valid_conf = conf_np[:nc].tolist()
    valid_noise = noise_np[:N - nc].tolist()
    assert set(valid_conf).isdisjoint(valid_noise)
    assert sorted(valid_conf + valid_noise) == list(range(N))

    got_mask = np.zeros(N, dtype=bool)
    got_mask[conf_np[:nc]] = True

    # avg matches (approx reciprocal + one Newton step -> near-exact).
    assert np.allclose(np.asarray(avg), np.asarray(avg_full_ref), atol=1e-3)
    # Confident/noisy split matches the exact reference on all non-borderline rows.
    clear = np.abs(margin) > 2e-3
    assert np.array_equal(got_mask[clear], ref_mask[clear])
    # Reference loss is identically 0 (degenerate single-column cross-entropy).
    assert float(loss) == 0.0

    print("KERNEL_OK")
</pallas_src>

<mosaic_0001>
module attributes {stable_mosaic.version = 11 : i64} {
  func.func @dce_kernel(%arg0: memref<7x128xf32, #tpu.memory_space<vmem>>, %arg1: memref<1x128xi32, #tpu.memory_space<vmem>>, %arg2: memref<8x128xf32, #tpu.memory_space<vmem>>) attributes {dimension_semantics = [], scalar_prefetch = 0 : i64, scratch_operands = 0 : i64, tpu.core_type = #tpu.core_type<tc>} {
    %c0 = arith.constant 0 : index
    %c0_0 = arith.constant 0 : index
    %0 = vector.load %arg0[%c0, %c0_0] : memref<7x128xf32, #tpu.memory_space<vmem>>, vector<7x128xf32>
    %c0_1 = arith.constant 0 : index
    %c0_2 = arith.constant 0 : index
    %1 = vector.load %arg1[%c0_1, %c0_2] : memref<1x128xi32, #tpu.memory_space<vmem>>, vector<1x128xi32>
    %2 = tpu.iota {dimensions = array<i32: 0>} : vector<7x128xi32>
    %3 = tpu.iota {dimensions = array<i32: 1>} : vector<7x128xi32>
    %4 = vector.broadcast %1 : vector<1x128xi32> to vector<7x128xi32>
    %5 = arith.cmpi eq, %2, %4 : vector<7x128xi32>
    %6 = arith.extui %5 : vector<7x128xi1> to vector<7x128xi32>
    %7 = arith.sitofp %6 : vector<7x128xi32> to vector<7x128xf32>
    %cst = arith.constant dense<0xFF800000> : vector<128xf32>
    %8 = vector.multi_reduction <maximumf>, %0, %cst [0] : vector<7x128xf32> to vector<128xf32>
    %9 = vector.shape_cast %8 : vector<128xf32> to vector<1x128xf32>
    %10 = vector.broadcast %9 : vector<1x128xf32> to vector<7x128xf32>
    %11 = arith.subf %0, %10 : vector<7x128xf32>
    %12 = math.exp %11 : vector<7x128xf32>
    %cst_3 = arith.constant dense<0.000000e+00> : vector<128xf32>
    %13 = vector.multi_reduction <add>, %12, %cst_3 [0] : vector<7x128xf32> to vector<128xf32>
    %14 = vector.shape_cast %13 : vector<128xf32> to vector<1x128xf32>
    %15 = tpu.reciprocal %14 {approx = true} : vector<1x128xf32> -> vector<1x128xf32>
    %16 = arith.mulf %14, %15 : vector<1x128xf32>
    %cst_4 = arith.constant 2.000000e+00 : f32
    %17 = vector.broadcast %cst_4 : f32 to vector<1x128xf32>
    %18 = arith.subf %17, %16 : vector<1x128xf32>
    %19 = arith.mulf %15, %18 : vector<1x128xf32>
    %20 = vector.broadcast %19 : vector<1x128xf32> to vector<7x128xf32>
    %21 = arith.mulf %12, %20 : vector<7x128xf32>
    %cst_5 = arith.constant 9.99999993E-9 : f32
    %cst_6 = arith.constant 1.000000e+00 : f32
    %22 = vector.broadcast %cst_5 : f32 to vector<7x128xf32>
    %23 = arith.maximumf %22, %21 : vector<7x128xf32>
    %24 = vector.broadcast %cst_6 : f32 to vector<7x128xf32>
    %25 = arith.minimumf %24, %23 : vector<7x128xf32>
    %26 = tpu.iota {dimensions = array<i32: 1>} : vector<1x128xi32>
    %c8_i32 = arith.constant 8 : i32
    %27 = vector.broadcast %c8_i32 : i32 to vector<1x128xi32>
    %28 = arith.cmpi slt, %26, %27 : vector<1x128xi32>
    %29 = arith.extui %28 : vector<1x128xi1> to vector<1x128xi32>
    %30 = arith.sitofp %29 : vector<1x128xi32> to vector<1x128xf32>
    %31 = arith.mulf %7, %25 : vector<7x128xf32>
    %cst_7 = arith.constant dense<0.000000e+00> : vector<128xf32>
    %32 = vector.multi_reduction <add>, %31, %cst_7 [0] : vector<7x128xf32> to vector<128xf32>
    %33 = vector.shape_cast %32 : vector<128xf32> to vector<1x128xf32>
    %34 = vector.broadcast %30 : vector<1x128xf32> to vector<7x128xf32>
    %35 = arith.mulf %25, %34 : vector<7x128xf32>
    %cst_8 = arith.constant dense<0.000000e+00> : vector<7xf32>
    %36 = vector.multi_reduction <add>, %35, %cst_8 [1] : vector<7x128xf32> to vector<7xf32>
    %37 = vector.shape_cast %36 : vector<7xf32> to vector<7x1xf32>
    %cst_9 = arith.constant 1.250000e-01 : f32
    %38 = vector.broadcast %cst_9 : f32 to vector<7x1xf32>
    %39 = arith.mulf %37, %38 : vector<7x1xf32>
    %40 = vector.broadcast %39 : vector<7x1xf32> to vector<7x128xf32>
    %41 = arith.mulf %7, %40 : vector<7x128xf32>
    %cst_10 = arith.constant dense<0.000000e+00> : vector<128xf32>
    %42 = vector.multi_reduction <add>, %41, %cst_10 [0] : vector<7x128xf32> to vector<128xf32>
    %43 = vector.shape_cast %42 : vector<128xf32> to vector<1x128xf32>
    %44 = arith.cmpf oge, %33, %43 : vector<1x128xf32>
    %45 = arith.extui %44 : vector<1x128xi1> to vector<1x128xi32>
    %46 = arith.sitofp %45 : vector<1x128xi32> to vector<1x128xf32>
    %47 = arith.cmpi eq, %2, %3 : vector<7x128xi32>
    %48 = arith.extui %47 : vector<7x128xi1> to vector<7x128xi32>
    %49 = arith.sitofp %48 : vector<7x128xi32> to vector<7x128xf32>
    %50 = vector.broadcast %39 : vector<7x1xf32> to vector<7x128xf32>
    %51 = arith.mulf %49, %50 : vector<7x128xf32>
    %cst_11 = arith.constant dense<0.000000e+00> : vector<128xf32>
    %52 = vector.multi_reduction <add>, %51, %cst_11 [0] : vector<7x128xf32> to vector<128xf32>
    %53 = vector.shape_cast %52 : vector<128xf32> to vector<1x128xf32>
    %c0_12 = arith.constant 0 : index
    %c0_13 = arith.constant 0 : index
    %54 = vector.load %arg2[%c0_12, %c0_13] : memref<8x128xf32, #tpu.memory_space<vmem>>, vector<1x128xf32>
    tpu.vector_store %arg2[%c0_12, %c0_13], %46 {strides = array<i32>} : memref<8x128xf32, #tpu.memory_space<vmem>>, vector<1x128xf32>,
    %c1 = arith.constant 1 : index
    %c0_14 = arith.constant 0 : index
    %55 = vector.load %arg2[%c1, %c0_14] : memref<8x128xf32, #tpu.memory_space<vmem>>, vector<1x128xf32>
    tpu.vector_store %arg2[%c1, %c0_14], %53 {strides = array<i32>} : memref<8x128xf32, #tpu.memory_space<vmem>>, vector<1x128xf32>,
    return
  }
}

</mosaic_0001>

<bundles_post_ra>
// kernel: dce_forward.1
= control target key start
LH: loop header
LB: loop body
LE: loop exit
PB: predicated region body
PF: predicated region fallthrough
CT: control target
= control target key end

     0   :  { %vm24_vm0 = vcmask 1046528   ;;  %v13_v18 = vlaneseq  ;;  %v103_v28 = vmov 0.0   ;;  %s137_s0 = inlined_call_operand.vmem [shape: f32[7,128], index: 0, kind: input, shape index: {}]   ;;  %s138_s1 = inlined_call_operand.vmem [shape: s32[1,128], index: 1, kind: input, shape index: {}]   ;;  %s139_s2 = inlined_call_operand.vmem [shape: f32[8,128], index: 2, kind: output, shape index: {}]  }
   0x1   :  { %v11_v0 = vld [vmem:[%s137_s0] sm:$0x7f] }
   0x2   :  { %v25_v1 = vsel %vm24_vm0, %v11_v0, -inf  ;;  %v16_v21 = vand.u32 127, %v13_v18  ;;  %v14_v23 = vshrl.u32 %v13_v18, 7  ;;  %v93_v24 = vld [vmem:[%s138_s1] ss:$0 sm:$0xff] }
   0x3   :  { %v26_v2 = vrot.slane %v25_v1, 4 }
   0x4   :  { %vm49_vm1 = vcmp.lt.s32.totalorder %v16_v21, 8  ;;  %vm21_vm2 = vcmp.eq.s32.totalorder %v14_v23, %v93_v24  ;;  %vm76_vm3 = vcmp.eq.s32.totalorder %v14_v23, %v16_v21 }
   0x5   :  { %v27_v3 = vmax.f32 %v25_v1, %v26_v2  ;;  %v95_v29 = vsel %vm49_vm1, 1.0, %v103_v28  ;;  %v94_v30 = vsel %vm21_vm2, 1.0, %v103_v28  ;;  %v97_v39 = vsel %vm76_vm3, 1.0, %v103_v28 }
   0x7   :  { %v28_v4 = vrot.slane %v27_v3, 2 }
   0x9   :  { %v29_v5 = vmax.f32 %v27_v3, %v28_v4 }
   0xb   :  { %v30_v6 = vrot.slane %v29_v5, 1 }
   0xd   :  { %v31_v7 = vmax.f32 %v29_v5, %v30_v6 }
   0xf   :  { %v32_v8 = vsub.f32 %v11_v0, %v31_v7 }
  0x11   :  { %v33_v9 = vmul.f32 1.442695, %v32_v8 }
  0x13   :  { %99 = vpow2.f32 %v33_v9 }
  0x1d   :  { %v100_v10 = vpop.eup %99 }
  0x1e   :  { %v35_v11 = vsel %vm24_vm0, %v100_v10, 0.0 }
  0x1f   :  { %v36_v12 = vrot.slane %v35_v11, 4 }
  0x21   :  { %v37_v13 = vadd.f32 %v36_v12, %v35_v11 }
  0x23   :  { %v38_v14 = vrot.slane %v37_v13, 2 }
  0x25   :  { %v39_v15 = vadd.f32 %v38_v14, %v37_v13 }
  0x27   :  { %v40_v16 = vrot.slane %v39_v15, 1 }
  0x29   :  { %v41_v17 = vadd.f32 %v40_v16, %v39_v15 }
  0x2b   :  { %101 = vrcp.f32 %v41_v17 }
  0x35   :  { %v102_v19 = vpop.eup %101 }
  0x36   :  { %v43_v20 = vmul.f32 %v102_v19, %v41_v17 }
  0x38   :  { %v44_v22 = vsub.f32 2.0, %v43_v20 }
  0x3a   :  { %v45_v25 = vmul.f32 %v102_v19, %v44_v22 }
  0x3c   :  { %v46_v26 = vmul.f32 %v100_v10, %v45_v25 }
  0x3e   :  { %v47_v27 = vmax.f32 %v46_v26, 1e-08 }
  0x40   :  { %v48_v31 = vmin.f32 %v47_v27, 1.0 }
  0x42   :  { %v60_v32 = vmul.f32 %v95_v29, %v48_v31  ;;  %v52_v33 = vmul.f32 %v94_v30, %v48_v31 }
  0x44   :  { %v61_v34 = vsel %vm24_vm0, %v60_v32, 0.0  ;;  %v53_v35 = vsel %vm24_vm0, %v52_v33, 0.0 }
  0x45   :  { %62 = vadd.xlane.f32.xlu0 %v61_v34  ;;  %v54_v36 = vrot.slane %v53_v35, 4 }
  0x47   :  { %v55_v37 = vadd.f32 %v54_v36, %v53_v35 }
  0x49   :  { %v56_v41 = vrot.slane %v55_v37, 2 }
  0x4b   :  { %v57_v46 = vadd.f32 %v56_v41, %v55_v37 }
  0x4d   :  { %v58_v51 = vrot.slane %v57_v46, 1 }
  0x4f   :  { %v59_v56 = vadd.f32 %v58_v51, %v57_v46 }
  0xd2   :  { %v63_v38 = vpop.xlane.xlu0 %62 }
  0xd3   :  { %v64_v40 = vmul.f32 0.125, %v63_v38 }
  0xd5   :  { %v65_v42 = vmul.f32 %v94_v30, %v64_v40  ;;  %v79_v43 = vmul.f32 %v97_v39, %v64_v40 }
  0xd7   :  { %v66_v44 = vsel %vm24_vm0, %v65_v42, 0.0  ;;  %v80_v45 = vsel %vm24_vm0, %v79_v43, 0.0 }
  0xd8   :  { %v67_v47 = vrot.slane %v66_v44, 4  ;;  %v81_v48 = vrot.slane %v80_v45, 4 }
  0xda   :  { %v68_v49 = vadd.f32 %v67_v47, %v66_v44  ;;  %v82_v50 = vadd.f32 %v81_v48, %v80_v45 }
  0xdc   :  { %v69_v52 = vrot.slane %v68_v49, 2  ;;  %v83_v53 = vrot.slane %v82_v50, 2 }
  0xde   :  { %v70_v54 = vadd.f32 %v69_v52, %v68_v49  ;;  %v84_v55 = vadd.f32 %v83_v53, %v82_v50 }
  0xe0   :  { %v71_v57 = vrot.slane %v70_v54, 1  ;;  %v85_v58 = vrot.slane %v84_v55, 1 }
  0xe2   :  { %v72_v59 = vadd.f32 %v71_v57, %v70_v54  ;;  %v86_v60 = vadd.f32 %v85_v58, %v84_v55 }
  0xe4   :  { %vm73_vm4 = vcmp.ge.f32.partialorder %v59_v56, %v72_v59  ;;  %88 = vst [vmem:[%s139_s2 + $0x1] sm:$0x1] %v86_v60 }
  0xe5   :  { %v96_v61 = vsel %vm73_vm4, 1.0, %v103_v28 }
  0xe6   :  { %87 = vst [vmem:[%s139_s2] sm:$0x1] %v96_v61 }

</bundles_post_ra>
